<compile_context>
chip_gen: v7x
topology: tpu7x:2x2x1
jax: 0.10.0
libtpu: 0.0.40
codegen_flags: <defaults>
</compile_context>

<pallas_src>
import functools

import jax
import jax.numpy as jnp
from jax.experimental import pallas as pl
from jax.experimental.pallas import tpu as pltpu


def _conv_bias_relu_kernel(p_ref, w_ref, b_ref, o_ref, acc_ref):
    """One (tm, tk) x (tk, OCp) MXU step of the im2col GEMM.

    p_ref:   (tm, tk)  bf16 binarized patches (+/-1 or 0; exact in bf16).
    w_ref:   (tk, OCp) bf16 conv weights (rows/cols zero-padded).
    b_ref:   (1, OCp)  f32 bias (zero-padded).
    o_ref:   (tm, OCp) f32 output tile (written on the last K step).
    acc_ref: (tm, OCp) f32 accumulator scratch (lives across the K axis).
    """
    k = pl.program_id(1)

    @pl.when(k == 0)
    def _init():
        acc_ref[...] = jnp.zeros_like(acc_ref)

    # bf16 x bf16 -> f32 on the MXU; no VPU upcast of the patch tile.
    acc_ref[...] += jnp.dot(p_ref[...], w_ref[...],
                            preferred_element_type=jnp.float32)

    @pl.when(k == pl.num_programs(1) - 1)
    def _finalize():
        o_ref[...] = jnp.maximum(acc_ref[...] + b_ref[...], 0.0).astype(o_ref.dtype)


def _vmem_limit_bytes():
    """Scoped-VMEM limit: ~3/4 of physical, capped so it is safe on v7x."""
    try:
        info = pltpu.get_tpu_info()
        phys = int(getattr(info, "vmem_capacity_bytes", 64 * 1024 * 1024))
    except Exception:  # conservative fallback (v7x per-core VMEM)
        phys = 64 * 1024 * 1024
    return max(32 * 1024 * 1024, min(3 * phys // 4, 100 * 1024 * 1024))


def _choose_tiles(M, K, OCp, vmem_limit, tm_max=1024):
    """Pick (tm, tk, Kp). All static Python ints (shapes are static)."""
    # --- K (reduction) tiling: pad to a 128 multiple only if cheap (<=15%). ---
    k128 = pl.cdiv(K, 128) * 128
    Kp = k128 if (k128 - K) * 20 <= 3 * K else K
    if Kp % 128 == 0 and Kp > 1024:
        tk = next(c for c in (512, 256, 128) if Kp % c == 0)
    else:
        tk = Kp                                   # single reduction step

    # --- M tiling: biggest tile that fits the budget; >=2 blocks when M is
    # large enough so v7x's two TensorCores both get work.  (No ">=8 steps"
    # rule: on single-TC v5e/v6e the grid is a purely serial loop.)
    budget = 4 * min(vmem_limit, 48 * 1024 * 1024) // 5
    tm = min(tm_max, max(128, pl.cdiv(M, 128) * 128))
    while tm > 128:
        need = (2 * tm * tk * 2        # double-buffered bf16 patch blocks
                + 2 * tk * OCp * 2     # double-buffered bf16 weight blocks
                + 2 * OCp * 4          # bias
                + 2 * tm * OCp * 4     # double-buffered f32 output blocks
                + tm * OCp * 4)        # f32 accumulator scratch
        if need <= budget and (M <= 256 or pl.cdiv(M, tm) >= 2):
            break
        tm //= 2
    return tm, tk, Kp


def bin_conv2d(x, gamma, beta, conv_w, conv_b, *, kernel_size, stride, padding,
               eps=1e-4):
    """Forward pass of BinConv2d (dropout=0 path). x: (N, C, H, W) float32."""
    N, C, H, W = x.shape
    OC = conv_w.shape[0]
    KH = KW = kernel_size

    # ---- BatchNorm2d (module default = training mode: batch stats, biased var) ----
    mean = jnp.mean(x, axis=(0, 2, 3))
    var = jnp.mean((x - mean[None, :, None, None]) ** 2, axis=(0, 2, 3))
    scale = gamma / jnp.sqrt(var + eps)
    shift = beta - mean * scale

    # ---- BN normalize + binarize (sign), NHWC so channel is minor ----
    # Elementwise glue; XLA fuses it with the transpose / im2col slicing, so no
    # separate kernel launch and no f32 round-trip of the activation slab.
    x_nhwc = jnp.transpose(x, (0, 2, 3, 1))
    x_bin = jnp.sign(x_nhwc * scale + shift).astype(jnp.bfloat16)
    # NOTE: BinActive also returns mean(|x|) over channels, but it is unused
    # downstream in BinConv2d.forward, so it is not materialized here.

    # ---- im2col (glue), columns in (kh, kw, c)-minor order, zero padding ----
    # TODO(synk): for mem-bound small-OC layers, replace the 9x-duplicating
    # im2col with an in-kernel spatial-band DMA (memory_space=pl.ANY +
    # make_async_copy of rows+halo) accumulating KH*KW small (tm,C)x(C,OCp)
    # matmuls, so each activation byte is read from HBM roughly once.
    OH = (H + 2 * padding - KH) // stride + 1
    OW = (W + 2 * padding - KW) // stride + 1
    xp = jnp.pad(x_bin, ((0, 0), (padding, padding), (padding, padding), (0, 0)))
    cols = []
    for kh in range(KH):
        for kw in range(KW):
            cols.append(xp[:, kh:kh + (OH - 1) * stride + 1:stride,
                           kw:kw + (OW - 1) * stride + 1:stride, :])
    patches = jnp.concatenate(cols, axis=-1).reshape(N * OH * OW, KH * KW * C)

    # Reorder the (tiny) weight matrix instead of transposing the big patch
    # tensor: (OC, C, KH, KW) -> (KH, KW, C, OC) -> (KH*KW*C, OC).
    w_mat = jnp.transpose(conv_w, (2, 3, 1, 0)).reshape(KH * KW * C, OC)

    M, K = patches.shape

    # Lane-dense output: zero-pad OC to a multiple of 128 (sliced off below).
    OCp = pl.cdiv(OC, 128) * 128

    vmem_limit = _vmem_limit_bytes()
    tm, tk, Kp = _choose_tiles(M, K, OCp, vmem_limit)
    nk = Kp // tk
    Mp = pl.cdiv(M, tm) * tm
    nm = Mp // tm

    # Pad consistently: extra K columns in the patches pair with extra zero
    # weight rows, so the padded contraction terms contribute exactly 0.
    patches_p = jnp.pad(patches, ((0, Mp - M), (0, Kp - K)))
    w_p = jnp.pad(w_mat, ((0, Kp - K), (0, OCp - OC))).astype(jnp.bfloat16)
    b_p = jnp.pad(conv_b, (0, OCp - OC)).reshape(1, OCp).astype(jnp.float32)

    cost = pl.CostEstimate(
        flops=2 * Mp * Kp * OCp,
        transcendentals=0,
        bytes_accessed=(Mp * Kp * 2            # bf16 patch stream, read once
                        + nm * Kp * OCp * 2    # bf16 weights, re-read per M block
                        + OCp * 4              # bias
                        + Mp * OCp * 4),       # f32 output store
    )

    out = pl.pallas_call(
        _conv_bias_relu_kernel,
        out_shape=jax.ShapeDtypeStruct((Mp, OCp), jnp.float32),
        grid=(nm, nk),
        in_specs=[pl.BlockSpec((tm, tk), lambda i, k: (i, k)),
                  pl.BlockSpec((tk, OCp), lambda i, k: (k, 0)),
                  pl.BlockSpec((1, OCp), lambda i, k: (0, 0))],
        out_specs=pl.BlockSpec((tm, OCp), lambda i, k: (i, 0)),
        scratch_shapes=[pltpu.VMEM((tm, OCp), jnp.float32)],
        compiler_params=pltpu.CompilerParams(
            dimension_semantics=("parallel", "arbitrary"),
            vmem_limit_bytes=vmem_limit,
        ),
        cost_estimate=cost,
    )(patches_p, w_p, b_p)

    # Slice + reshape + NHWC->NCHW transpose stay in one XLA fusion (no extra
    # HBM pass for the OC slice).  Module semantics require NCHW f32 output.
    out = out[:M, :OC].reshape(N, OH, OW, OC)
    return jnp.transpose(out, (0, 3, 1, 2)).astype(x.dtype)


if __name__ == "__main__":
    key = jax.random.PRNGKey(0)
    k1, k2, k3 = jax.random.split(key, 3)

    # Small shapes consistent with the module: NCHW input.
    N, C, H, W = 2, 4, 16, 16
    OC, KS, STRIDE, PAD = 8, 3, 1, 1

    x = jax.random.normal(k1, (N, C, H, W), jnp.float32)
    # BatchNorm params per __init__: weight zero_().add(1.0) -> ones, bias -> zeros.
    gamma = jnp.ones((C,), jnp.float32)
    beta = jnp.zeros((C,), jnp.float32)
    conv_w = jax.random.normal(k2, (OC, C, KS, KS), jnp.float32) * 0.1
    conv_b = jax.random.normal(k3, (OC,), jnp.float32) * 0.1

    fwd = jax.jit(functools.partial(bin_conv2d, kernel_size=KS, stride=STRIDE,
                                    padding=PAD))
    y = jax.block_until_ready(fwd(x, gamma, beta, conv_w, conv_b))
    assert y.shape == (N, OC, H, W), y.shape

    # Reference check in plain JAX (same semantics as the PyTorch forward).
    mean = jnp.mean(x, axis=(0, 2, 3), keepdims=True)
    var = jnp.mean((x - mean) ** 2, axis=(0, 2, 3), keepdims=True)
    xb = jnp.sign((x - mean) / jnp.sqrt(var + 1e-4) * gamma[None, :, None, None]
                  + beta[None, :, None, None])

    def conv_ref(w):
        r = jax.lax.conv_general_dilated(
            xb, w, window_strides=(STRIDE, STRIDE),
            padding=((PAD, PAD), (PAD, PAD)),
            dimension_numbers=("NCHW", "OIHW", "NCHW"),
            precision=jax.lax.Precision.HIGHEST)
        return jnp.maximum(r + conv_b[None, :, None, None], 0.0)

    # (a) Apples-to-apples: reference using the same bf16-rounded weights the
    #     kernel feeds the MXU -> must match tightly (products are exact).
    ref_bf16w = conv_ref(conv_w.astype(jnp.bfloat16).astype(jnp.float32))
    err_a = float(jnp.max(jnp.abs(y - ref_bf16w)))
    assert jnp.allclose(y, ref_bf16w, atol=1e-4, rtol=1e-4), err_a

    # (b) Vs full-f32 weights: only the ~2^-9 relative bf16 weight rounding
    #     differs (K=36 terms), so a looser tolerance applies.
    ref_f32 = conv_ref(conv_w)
    err_b = float(jnp.max(jnp.abs(y - ref_f32)))
    assert jnp.allclose(y, ref_f32, atol=3e-2, rtol=3e-2), err_b

    print("KERNEL_OK")
</pallas_src>

<mosaic_0001>
module attributes {stable_mosaic.version = 11 : i64} {
  func.func @_conv_bias_relu_kernel(%arg0: i32, %arg1: i32, %arg2: memref<256x36xbf16, #tpu.memory_space<vmem>>, %arg3: memref<36x128xbf16, #tpu.memory_space<vmem>>, %arg4: memref<1x128xf32, #tpu.memory_space<vmem>>, %arg5: memref<256x128xf32, #tpu.memory_space<vmem>>, %arg6: memref<256x128xf32, #tpu.memory_space<vmem>>) attributes {dimension_semantics = [#tpu.dimension_semantics<parallel>, #tpu.dimension_semantics<arbitrary>], iteration_bounds = array<i64: 2, 1>, scalar_prefetch = 0 : i64, scratch_operands = 1 : i64, tpu.core_type = #tpu.core_type<tc>, window_params = [{transform_indices = @transform_0, window_bounds = array<i64: 256, 36>}, {transform_indices = @transform_1, window_bounds = array<i64: 36, 128>}, {pipeline_mode = #tpu.pipeline_mode<synchronous>, transform_indices = @transform_2, window_bounds = array<i64: 1, 128>}, {transform_indices = @transform_3, window_bounds = array<i64: 256, 128>}]} {
    %c0_i32 = arith.constant 0 : i32
    %0 = arith.cmpi eq, %arg1, %c0_i32 : i32
    %1 = arith.extui %0 : i1 to i32
    %c0_i32_0 = arith.constant 0 : i32
    %2 = arith.cmpi ne, %1, %c0_i32_0 : i32
    scf.if %2 {
      %cst_10 = arith.constant 0.000000e+00 : f32
      %12 = vector.broadcast %cst_10 : f32 to vector<256x128xf32>
      %c0_11 = arith.constant 0 : index
      %c0_12 = arith.constant 0 : index
      %13 = vector.load %arg6[%c0_11, %c0_12] : memref<256x128xf32, #tpu.memory_space<vmem>>, vector<256x128xf32>
      tpu.vector_store %arg6[%c0_11, %c0_12], %12 {strides = array<i32>} : memref<256x128xf32, #tpu.memory_space<vmem>>, vector<256x128xf32>,
    } else {
    }
    %c0 = arith.constant 0 : index
    %c0_1 = arith.constant 0 : index
    %3 = vector.load %arg6[%c0, %c0_1] : memref<256x128xf32, #tpu.memory_space<vmem>>, vector<256x128xf32>
    %c0_2 = arith.constant 0 : index
    %c0_3 = arith.constant 0 : index
    %4 = vector.load %arg2[%c0_2, %c0_3] : memref<256x36xbf16, #tpu.memory_space<vmem>>, vector<256x36xbf16>
    %c0_4 = arith.constant 0 : index
    %c0_5 = arith.constant 0 : index
    %5 = vector.load %arg3[%c0_4, %c0_5] : memref<36x128xbf16, #tpu.memory_space<vmem>>, vector<36x128xbf16>
    %cst = arith.constant dense<0.000000e+00> : vector<256x128xf32>
    %6 = tpu.matmul %4, %5, %cst {dimension_numbers = #tpu.dot_dimension_numbers<[1], [0], [0], [1], [0, 0, 1, 1], [], []>} : vector<256x36xbf16>, vector<36x128xbf16>, vector<256x128xf32> -> vector<256x128xf32>
    %7 = arith.addf %3, %6 : vector<256x128xf32>
    %c0_6 = arith.constant 0 : index
    %c0_7 = arith.constant 0 : index
    %8 = vector.load %arg6[%c0_6, %c0_7] : memref<256x128xf32, #tpu.memory_space<vmem>>, vector<256x128xf32>
    tpu.vector_store %arg6[%c0_6, %c0_7], %7 {strides = array<i32>} : memref<256x128xf32, #tpu.memory_space<vmem>>, vector<256x128xf32>,
    %c0_i32_8 = arith.constant 0 : i32
    %9 = arith.cmpi eq, %arg1, %c0_i32_8 : i32
    %10 = arith.extui %9 : i1 to i32
    %c0_i32_9 = arith.constant 0 : i32
    %11 = arith.cmpi ne, %10, %c0_i32_9 : i32
    scf.if %11 {
      %c0_10 = arith.constant 0 : index
      %c0_11 = arith.constant 0 : index
      %12 = vector.load %arg6[%c0_10, %c0_11] : memref<256x128xf32, #tpu.memory_space<vmem>>, vector<256x128xf32>
      %c0_12 = arith.constant 0 : index
      %c0_13 = arith.constant 0 : index
      %13 = vector.load %arg4[%c0_12, %c0_13] : memref<1x128xf32, #tpu.memory_space<vmem>>, vector<1x128xf32>
      %14 = vector.broadcast %13 : vector<1x128xf32> to vector<256x128xf32>
      %15 = arith.addf %12, %14 : vector<256x128xf32>
      %cst_14 = arith.constant 0.000000e+00 : f32
      %16 = vector.broadcast %cst_14 : f32 to vector<256x128xf32>
      %17 = arith.maximumf %15, %16 : vector<256x128xf32>
      %c0_15 = arith.constant 0 : index
      %c0_16 = arith.constant 0 : index
      %18 = vector.load %arg5[%c0_15, %c0_16] : memref<256x128xf32, #tpu.memory_space<vmem>>, vector<256x128xf32>
      tpu.vector_store %arg5[%c0_15, %c0_16], %17 {strides = array<i32>} : memref<256x128xf32, #tpu.memory_space<vmem>>, vector<256x128xf32>,
    } else {
    }
    return
  }
  func.func @transform_0(%arg0: i32, %arg1: i32) -> (i32, i32) {
    %c0_i32 = arith.constant 0 : i32
    return %arg0, %arg1 : i32, i32
  }
  func.func @transform_1(%arg0: i32, %arg1: i32) -> (i32, i32) {
    %c0_i32 = arith.constant 0 : i32
    %c0_i32_0 = arith.constant 0 : i32
    return %arg1, %c0_i32 : i32, i32
  }
  func.func @transform_2(%arg0: i32, %arg1: i32) -> (i32, i32) {
    %c0_i32 = arith.constant 0 : i32
    %c0_i32_0 = arith.constant 0 : i32
    %c0_i32_1 = arith.constant 0 : i32
    return %c0_i32, %c0_i32_0 : i32, i32
  }
  func.func @transform_3(%arg0: i32, %arg1: i32) -> (i32, i32) {
    %c0_i32 = arith.constant 0 : i32
    %c0_i32_0 = arith.constant 0 : i32
    return %arg0, %c0_i32 : i32, i32
  }
}

</mosaic_0001>

<bundles_post_ra>
// kernel: bin_conv2d.1
= control target key start
LH: loop header
LB: loop body
LE: loop exit
PB: predicated region body
PF: predicated region fallthrough
CT: control target
= control target key end

     0   :  { %s1119_s12 = smov 0   ;;  %s1121_s13 = smov 0   ;;  %s1270_s0 = inlined_call_operand.vmem [shape: bf16[512,36], index: 0, kind: input, shape index: {}]   ;;  %s1271_s1 = inlined_call_operand.vmem [shape: bf16[36,128], index: 1, kind: input, shape index: {}]   ;;  %s1272_s2 = inlined_call_operand.vmem [shape: f32[1,128], index: 2, kind: input, shape index: {}]   ;;  %s1273_s3 = inlined_call_operand.vmem [shape: f32[512,128], index: 3, kind: output, shape index: {}]  }
   0x1   :  { %s1123_s14 = smov 0  }
   0x2 LB: > { %s25_s15 = sadd.s32 1, %s1093_s13  ;;  %p924_p0 = scmp.ge.s32.totalorder %s1097_s14, 1  ;;  %s1097_s14 = sphi %s1123_s14, %s13_s14   ;;  %s1093_s13 = sphi %s1121_s13, %s1275_s13   ;;  %s1089_s12 = sphi %s1119_s12, %s1274_s12  }
   0x3   : > { %p27_p1 = scmp.ge.s32.totalorder %s25_s15, 2  ;;  %p166_p2 = scmp.lt.s32.totalorder %s1097_s14, 3 }
   0x5   : > { %s1277_s15 = smov (%p27_p1, %s25_s15), 0  ;;  %p167_p3 = pnand %p924_p0, %p166_p2 }
   0x6   : > { %v1056_v0 = vld [vmem:[%s1271_s1] sm:$0xff] (!%p167_p3)   ;;  %v1057_v1 = vld [vmem:[%s1271_s1 + $0x8] sm:$0xff] (!%p167_p3)   ;;  %s925_s20 = sshll.u32 (!%p167_p3), %s1089_s12, 5  ;;  %v1058_v2 = vld [vmem:[%s1271_s1 + $0x10] ss:$0 sps:$4 sm:$0x33] (!%p167_p3)  }
   0x7   : > { %170 = sbr.rel (%p167_p3) target bundleno = 264 (0x108), region = 32  ;;  %986 = vmatprep.subr.bf16.mxu0 (!%p167_p3), %v1056_v0  ;;  %1024 = vmatprep.subr.bf16.mxu1 (!%p167_p3), %v1056_v0  ;;  %p199_p4 = scmp.lt.s32.totalorder (!%p167_p3), %s925_s20, 63  ;;  %vm469_vm0 = vcmask (!%p167_p3), 1041408   ;;  %vm420_vm1 = vcmask (!%p167_p3), 293888   ;;  %v1189_v20 = vld [vmem:[%s1272_s2] ss:$0 sm:$0xff] (!%p167_p3) }
   0x8   : > { %987 = vmatpush3.bf16.msra.mxu0 (!%p167_p3), %v1056_v0  ;;  %1027 = vmatpush3.bf16.msra.mxu1 (!%p167_p3), %v1056_v0  ;;  %v471_v3 = vsel (!%p167_p3), %vm469_vm0, %v1058_v2, 0 }
   0x9   : > { %988 = vmatprep.subr.bf16.mxu0 (!%p167_p3), %v1057_v1  ;;  %1025 = vmatprep.subr.bf16.mxu1 (!%p167_p3), %v1057_v1 }
   0xc   : > { %989 = vmatpush3.bf16.msra.mxu0 (!%p167_p3), %v1057_v1  ;;  %1028 = vmatpush3.bf16.msra.mxu1 (!%p167_p3), %v1057_v1 }
   0xd   : > { %1030 = vmatprep.subr.msk.bf16.mxu0 (!%p167_p3), %vm469_vm0, %v1058_v2  ;;  %1031 = vmatprep.subr.msk.bf16.mxu1 (!%p167_p3), %vm469_vm0, %v1058_v2 }
   0xe   : > { %s1279_s20 = smov (!%p199_p4, %s925_s20), 63 }
   0xf   : > { %s926_s23 = sshll.u32 %s1279_s20, 2  ;;  %s928_s29 = sshll.u32 %s1279_s20, 3 }
  0x10   : > { %s1152_s26 = scalar_lea.vmem %s1270_s0, %s926_s23  ;;  %991 = vmatpush3.bf16.msra.mxu0 %v471_v3  ;;  %1029 = vmatpush3.bf16.msra.mxu1 %v471_v3  ;;  %s1197_s5 = scalar_lea.vmem %s1273_s3, %s928_s29 }
  0x11   : > { %v1059_v4 = vld [vmem:[%s1152_s26] sm:$0xff]   ;;  %v1061_v6 = vld [vmem:[%s1152_s26 + $0x8] sm:$0xff]   ;;  %v1063_v8 = vld [vmem:[%s1152_s26 + $0x10] sm:$0xff]  }
  0x12   : > { %v1060_v5 = vld [vmem:[%s1152_s26 + $0x40] sm:$0xff]   ;;  %992 = vmatprep.mubr.msk.bf16.mxu0 %vm420_vm1, %v1059_v4  ;;  %v1062_v7 = vld [vmem:[%s1152_s26 + $0x48] sm:$0xff]   ;;  %v1064_v9 = vld [vmem:[%s1152_s26 + $0x50] sm:$0xff]  }
  0x13   : > { %1008 = vmatprep.mubr.msk.bf16.mxu1 %vm420_vm1, %v1060_v5  ;;  %993 = vmatmul.mubr.msk.bf16.vlgmr.msra.gmra.mrb[0].mxu0 %vm420_vm1, %v1061_v6  ;;  %v1065_v10 = vld [vmem:[%s1152_s26 + $0x18] sm:$0xff]   ;;  %v1067_v12 = vld [vmem:[%s1152_s26 + $0x20] sm:$0xff]   ;;  %v1069_v14 = vld [vmem:[%s1152_s26 + $0x28] sm:$0xff]  }
  0x14   : > { %1009 = vmatmul.mubr.msk.bf16.vlgmr.msra.gmra.mrb[0].mxu1 %vm420_vm1, %v1062_v7  ;;  %996 = vmatprep.mubr.msk.bf16.mxu0 %vm420_vm1, %v1063_v8  ;;  %v1066_v11 = vld [vmem:[%s1152_s26 + $0x58] sm:$0xff]   ;;  %v1068_v13 = vld [vmem:[%s1152_s26 + $0x60] sm:$0xff]   ;;  %v1070_v15 = vld [vmem:[%s1152_s26 + $0x68] sm:$0xff]  }
  0x15   : > { %1012 = vmatprep.mubr.msk.bf16.mxu1 %vm420_vm1, %v1064_v9  ;;  %v1071_v16 = vld [vmem:[%s1152_s26 + $0x30] sm:$0xff]   ;;  %v1073_v18 = vld [vmem:[%s1152_s26 + $0x38] sm:$0xff]  }
  0x16   : > { %v1072_v17 = vld [vmem:[%s1152_s26 + $0x70] sm:$0xff]   ;;  %v1074_v19 = vld [vmem:[%s1152_s26 + $0x78] sm:$0xff]  }
  0x1b   : > { %997 = vmatmul.mubr.msk.bf16.gmra.mrb[4].mxu0 %vm420_vm1, %v1065_v10 }
  0x1c   : > { %1013 = vmatmul.mubr.msk.bf16.gmra.mrb[4].mxu1 %vm420_vm1, %v1066_v11  ;;  %1000 = vmatprep.mubr.msk.bf16.mxu0 %vm420_vm1, %v1067_v12 }
  0x1d   : > { %1016 = vmatprep.mubr.msk.bf16.mxu1 %vm420_vm1, %v1068_v13 }
  0x23   : > { %1001 = vmatmul.mubr.msk.bf16.gmra.mrb[8].mxu0 %vm420_vm1, %v1069_v14 }
  0x24   : > { %1017 = vmatmul.mubr.msk.bf16.gmra.mrb[8].mxu1 %vm420_vm1, %v1070_v15  ;;  %1004 = vmatprep.mubr.msk.bf16.mxu0 %vm420_vm1, %v1071_v16 }
  0x25   : > { %1020 = vmatprep.mubr.msk.bf16.mxu1 %vm420_vm1, %v1072_v17 }
  0x2b   : > { %1005 = vmatmul.mubr.msk.bf16.gmra.mrb[12].mxu0 %vm420_vm1, %v1073_v18 }
  0x2c   : > { %1021 = vmatmul.mubr.msk.bf16.gmra.mrb[12].mxu1 %vm420_vm1, %v1074_v19 }
  0xe6   : > { %v994_v21 = vpop.f32.mrb[0].mxu0 }
  0xe7   : > { %v1010_v22 = vpop.f32.mrb[0].mxu1  ;;  %v742_v23 = vadd.f32 %v994_v21, %v1189_v20  ;;  %v507_v25 = vpop.f32.mrb[1].mxu0 }
  0xe8   : > { %v758_v24 = vadd.f32 %v1010_v22, %v1189_v20  ;;  %v571_v26 = vpop.f32.mrb[1].mxu1  ;;  %v740_v27 = vadd.f32 %v1189_v20, %v507_v25  ;;  %v995_v29 = vpop.f32.mrb[2].mxu0 }
  0xe9   : > { %v756_v28 = vadd.f32 %v1189_v20, %v571_v26  ;;  %v1011_v30 = vpop.f32.mrb[2].mxu1  ;;  %v774_v31 = vmax.f32 %v742_v23, 0.0  ;;  %v743_v33 = vadd.f32 %v995_v29, %v1189_v20  ;;  %v510_v35 = vpop.f32.mrb[3].mxu0 }
  0xea   : > { %v790_v32 = vmax.f32 %v758_v24, 0.0  ;;  %v759_v34 = vadd.f32 %v1011_v30, %v1189_v20  ;;  %v574_v36 = vpop.f32.mrb[3].mxu1  ;;  %v772_v37 = vmax.f32 %v740_v27, 0.0  ;;  %v741_v39 = vadd.f32 %v1189_v20, %v510_v35 }
  0xeb   : > { %v788_v38 = vmax.f32 %v756_v28, 0.0  ;;  %v757_v40 = vadd.f32 %v1189_v20, %v574_v36  ;;  %806 = vst [vmem:[%s1197_s5 + $0x10] sm:$0xff] %v774_v31  ;;  %v775_v41 = vmax.f32 %v743_v33, 0.0 }
  0xec   : > { %822 = vst [vmem:[%s1197_s5 + $0x90] sm:$0xff] %v790_v32  ;;  %v791_v42 = vmax.f32 %v759_v34, 0.0  ;;  %804 = vst [vmem:[%s1197_s5] sm:$0xff] %v772_v37  ;;  %v773_v43 = vmax.f32 %v741_v39, 0.0 }
  0xed   : > { %820 = vst [vmem:[%s1197_s5 + $0x80] sm:$0xff] %v788_v38  ;;  %v789_v44 = vmax.f32 %v757_v40, 0.0  ;;  %807 = vst [vmem:[%s1197_s5 + $0x18] sm:$0xff] %v775_v41 }
  0xee   : > { %823 = vst [vmem:[%s1197_s5 + $0x98] sm:$0xff] %v791_v42  ;;  %805 = vst [vmem:[%s1197_s5 + $0x8] sm:$0xff] %v773_v43  ;;  %v998_v45 = vpop.f32.mrb[4].mxu0 }
  0xef   : > { %821 = vst [vmem:[%s1197_s5 + $0x88] sm:$0xff] %v789_v44  ;;  %v1014_v46 = vpop.f32.mrb[4].mxu1  ;;  %v746_v47 = vadd.f32 %v998_v45, %v1189_v20  ;;  %v523_v49 = vpop.f32.mrb[5].mxu0 }
  0xf0   : > { %v762_v48 = vadd.f32 %v1014_v46, %v1189_v20  ;;  %v587_v50 = vpop.f32.mrb[5].mxu1  ;;  %v744_v51 = vadd.f32 %v1189_v20, %v523_v49  ;;  %v999_v53 = vpop.f32.mrb[6].mxu0 }
  0xf1   : > { %v760_v52 = vadd.f32 %v1189_v20, %v587_v50  ;;  %v1015_v54 = vpop.f32.mrb[6].mxu1  ;;  %v778_v55 = vmax.f32 %v746_v47, 0.0  ;;  %v747_v57 = vadd.f32 %v999_v53, %v1189_v20  ;;  %v526_v59 = vpop.f32.mrb[7].mxu0 }
  0xf2   : > { %v794_v56 = vmax.f32 %v762_v48, 0.0  ;;  %v763_v58 = vadd.f32 %v1015_v54, %v1189_v20  ;;  %v590_v60 = vpop.f32.mrb[7].mxu1  ;;  %v776_v61 = vmax.f32 %v744_v51, 0.0  ;;  %v745_v63 = vadd.f32 %v1189_v20, %v526_v59 }
  0xf3   : > { %v792_v62 = vmax.f32 %v760_v52, 0.0  ;;  %v761_v0 = vadd.f32 %v1189_v20, %v590_v60  ;;  %810 = vst [vmem:[%s1197_s5 + $0x30] sm:$0xff] %v778_v55  ;;  %v779_v1 = vmax.f32 %v747_v57, 0.0 }
  0xf4   : > { %826 = vst [vmem:[%s1197_s5 + $0xb0] sm:$0xff] %v794_v56  ;;  %v795_v2 = vmax.f32 %v763_v58, 0.0  ;;  %808 = vst [vmem:[%s1197_s5 + $0x20] sm:$0xff] %v776_v61  ;;  %v777_v3 = vmax.f32 %v745_v63, 0.0 }
  0xf5   : > { %824 = vst [vmem:[%s1197_s5 + $0xa0] sm:$0xff] %v792_v62  ;;  %v793_v4 = vmax.f32 %v761_v0, 0.0  ;;  %811 = vst [vmem:[%s1197_s5 + $0x38] sm:$0xff] %v779_v1 }
  0xf6   : > { %827 = vst [vmem:[%s1197_s5 + $0xb8] sm:$0xff] %v795_v2  ;;  %809 = vst [vmem:[%s1197_s5 + $0x28] sm:$0xff] %v777_v3  ;;  %v1002_v5 = vpop.f32.mrb[8].mxu0 }
  0xf7   : > { %825 = vst [vmem:[%s1197_s5 + $0xa8] sm:$0xff] %v793_v4  ;;  %v1018_v6 = vpop.f32.mrb[8].mxu1  ;;  %v750_v7 = vadd.f32 %v1002_v5, %v1189_v20  ;;  %v539_v9 = vpop.f32.mrb[9].mxu0 }
  0xf8   : > { %v766_v8 = vadd.f32 %v1018_v6, %v1189_v20  ;;  %v603_v10 = vpop.f32.mrb[9].mxu1  ;;  %v748_v11 = vadd.f32 %v1189_v20, %v539_v9  ;;  %v1003_v13 = vpop.f32.mrb[10].mxu0 }
  0xf9   : > { %v764_v12 = vadd.f32 %v1189_v20, %v603_v10  ;;  %v1019_v14 = vpop.f32.mrb[10].mxu1  ;;  %v782_v15 = vmax.f32 %v750_v7, 0.0  ;;  %v751_v17 = vadd.f32 %v1003_v13, %v1189_v20  ;;  %v542_v19 = vpop.f32.mrb[11].mxu0 }
  0xfa   : > { %v798_v16 = vmax.f32 %v766_v8, 0.0  ;;  %v767_v18 = vadd.f32 %v1019_v14, %v1189_v20  ;;  %v606_v21 = vpop.f32.mrb[11].mxu1  ;;  %v780_v22 = vmax.f32 %v748_v11, 0.0  ;;  %v749_v24 = vadd.f32 %v1189_v20, %v542_v19 }
  0xfb   : > { %v796_v23 = vmax.f32 %v764_v12, 0.0  ;;  %v765_v25 = vadd.f32 %v1189_v20, %v606_v21  ;;  %814 = vst [vmem:[%s1197_s5 + $0x50] sm:$0xff] %v782_v15  ;;  %v783_v26 = vmax.f32 %v751_v17, 0.0 }
  0xfc   : > { %830 = vst [vmem:[%s1197_s5 + $0xd0] sm:$0xff] %v798_v16  ;;  %v799_v27 = vmax.f32 %v767_v18, 0.0  ;;  %812 = vst [vmem:[%s1197_s5 + $0x40] sm:$0xff] %v780_v22  ;;  %v781_v28 = vmax.f32 %v749_v24, 0.0 }
  0xfd   : > { %828 = vst [vmem:[%s1197_s5 + $0xc0] sm:$0xff] %v796_v23  ;;  %v797_v29 = vmax.f32 %v765_v25, 0.0  ;;  %815 = vst [vmem:[%s1197_s5 + $0x58] sm:$0xff] %v783_v26 }
  0xfe   : > { %831 = vst [vmem:[%s1197_s5 + $0xd8] sm:$0xff] %v799_v27  ;;  %813 = vst [vmem:[%s1197_s5 + $0x48] sm:$0xff] %v781_v28  ;;  %v1006_v30 = vpop.f32.mrb[12].mxu0 }
  0xff   : > { %829 = vst [vmem:[%s1197_s5 + $0xc8] sm:$0xff] %v797_v29  ;;  %v1022_v31 = vpop.f32.mrb[12].mxu1  ;;  %v754_v32 = vadd.f32 %v1006_v30, %v1189_v20  ;;  %v555_v34 = vpop.f32.mrb[13].mxu0 }
 0x100   : > { %v770_v33 = vadd.f32 %v1022_v31, %v1189_v20  ;;  %v619_v35 = vpop.f32.mrb[13].mxu1  ;;  %v752_v36 = vadd.f32 %v1189_v20, %v555_v34  ;;  %v1007_v38 = vpop.f32.mrb[14].mxu0 }
 0x101   : > { %v768_v37 = vadd.f32 %v1189_v20, %v619_v35  ;;  %v1023_v39 = vpop.f32.mrb[14].mxu1  ;;  %v786_v40 = vmax.f32 %v754_v32, 0.0  ;;  %v755_v42 = vadd.f32 %v1007_v38, %v1189_v20  ;;  %v558_v44 = vpop.f32.mrb[15].mxu0 }
 0x102   : > { %v802_v41 = vmax.f32 %v770_v33, 0.0  ;;  %v771_v43 = vadd.f32 %v1023_v39, %v1189_v20  ;;  %v622_v45 = vpop.f32.mrb[15].mxu1  ;;  %v784_v46 = vmax.f32 %v752_v36, 0.0  ;;  %v753_v48 = vadd.f32 %v1189_v20, %v558_v44 }
 0x103   : > { %v800_v47 = vmax.f32 %v768_v37, 0.0  ;;  %v769_v49 = vadd.f32 %v1189_v20, %v622_v45  ;;  %818 = vst [vmem:[%s1197_s5 + $0x70] sm:$0xff] %v786_v40  ;;  %v787_v50 = vmax.f32 %v755_v42, 0.0 }
 0x104   : > { %834 = vst [vmem:[%s1197_s5 + $0xf0] sm:$0xff] %v802_v41  ;;  %v803_v51 = vmax.f32 %v771_v43, 0.0  ;;  %816 = vst [vmem:[%s1197_s5 + $0x60] sm:$0xff] %v784_v46  ;;  %v785_v52 = vmax.f32 %v753_v48, 0.0 }
 0x105   : > { %832 = vst [vmem:[%s1197_s5 + $0xe0] sm:$0xff] %v800_v47  ;;  %v801_v53 = vmax.f32 %v769_v49, 0.0  ;;  %819 = vst [vmem:[%s1197_s5 + $0x78] sm:$0xff] %v787_v50 }
 0x106   : > { %835 = vst [vmem:[%s1197_s5 + $0xf8] sm:$0xff] %v803_v51  ;;  %817 = vst [vmem:[%s1197_s5 + $0x68] sm:$0xff] %v785_v52 }
 0x107   : > { %833 = vst [vmem:[%s1197_s5 + $0xe8] sm:$0xff] %v801_v53 }
 0x108 PF: > { %s13_s14 = sadd.s32 1, %s1097_s14   ;;  %s1274_s12 = smov %s1093_s13 }
 0x109   : > { %p10_p5 = scmp.ge.s32.totalorder %s13_s14, 4   ;;  %s1275_s13 = smov %s1277_s15 }
 0x10b   :  { %12 = sbr.rel (!%p10_p5) target bundleno = 2 (0x2), region = 73 }

</bundles_post_ra>
